<compile_context>
chip_gen: v6e
topology: v6e:2x2x1
jax: 0.10.0
libtpu: 0.0.40
codegen_flags: <defaults>
</compile_context>

<pallas_src>
import functools
import math

import jax
import jax.numpy as jnp
import numpy as np
from jax import lax
from jax.experimental import pallas as pl
from jax.experimental.pallas import tpu as pltpu

TOP_K = 2          # fixed in the reference module
LANE = 128         # TPU lane width; expert hidden sizes are padded to this


# ----------------------------------------------------------------------------
# Tiling helpers
# ----------------------------------------------------------------------------
def _pick_tile_m(M):
    """Largest m-tile that divides M but keeps >=2 steps on the parallel axis
    (so v7x's second TensorCore is not idle); falls back to full M."""
    cap = max(8, M // 2)
    for t in (256, 128, 64, 32, 16, 8):
        if t <= cap and M % t == 0:
            return t
    return M


def _pick_tile(dim, prefs=(512, 256, 128)):
    for t in prefs:
        if dim % t == 0:
            return t
    return dim


def _pick_chunk(h_total, cap=1024):
    """Largest hidden-chunk width that divides the packed hidden size, is a
    multiple of 128 (lane-dense) and <= cap (bounds per-step VMEM on v7x)."""
    cands = [c for c in range(LANE, h_total + 1, LANE)
             if h_total % c == 0 and c <= cap]
    return max(cands) if cands else h_total


# ----------------------------------------------------------------------------
# Generic dense kernel (input projection, output head):  y = act(x @ W + b)
# K is tiled with an f32 VMEM accumulator (safe for large-vocab heads on v7x).
# ----------------------------------------------------------------------------
def _dense_kernel(x_ref, w_ref, b_ref, o_ref, acc_ref, *, activation):
    @pl.when(pl.program_id(2) == 0)
    def _():
        acc_ref[...] = jnp.zeros_like(acc_ref)

    acc_ref[...] += jnp.dot(x_ref[...].astype(jnp.bfloat16), w_ref[...],
                            preferred_element_type=jnp.float32)

    @pl.when(pl.program_id(2) == pl.num_programs(2) - 1)
    def _():
        y = acc_ref[...] + b_ref[...]
        if activation == "relu":
            y = jnp.maximum(y, 0.0)
        o_ref[...] = y.astype(o_ref.dtype)


def dense(x, w, b, activation=None, out_dtype=jnp.float32):
    """x:(M,K) f32/bf16, w:(K,N) bf16, b:(N,) f32 -> (M,N) out_dtype."""
    M, K = x.shape
    _, N = w.shape
    tm, tn, tk = _pick_tile_m(M), _pick_tile(N), _pick_tile(K)
    return pl.pallas_call(
        functools.partial(_dense_kernel, activation=activation),
        out_shape=jax.ShapeDtypeStruct((M, N), out_dtype),
        grid=(M // tm, N // tn, K // tk),
        in_specs=[
            pl.BlockSpec((tm, tk), lambda i, j, k: (i, k)),
            pl.BlockSpec((tk, tn), lambda i, j, k: (k, j)),
            pl.BlockSpec((1, tn), lambda i, j, k: (0, j)),
        ],
        out_specs=pl.BlockSpec((tm, tn), lambda i, j, k: (i, j)),
        scratch_shapes=[pltpu.VMEM((tm, tn), jnp.float32)],
        compiler_params=pltpu.CompilerParams(
            dimension_semantics=("parallel", "parallel", "arbitrary"),
            vmem_limit_bytes=32 * 1024 * 1024),
    )(x, w, b.reshape(1, -1))


# ----------------------------------------------------------------------------
# Fused attention layer:  LN1(x + MHA(x))   -- one dispatch, no grid
# ----------------------------------------------------------------------------
def _attn_layer_kernel(x_ref, m_ref, wqkv_ref, bqkv_ref, wo_ref, bo_ref,
                       g_ref, be_ref, o_ref, *, nhead, scale):
    B, S, D = x_ref.shape
    Dh = D // nhead
    # One QKV matmul over all B*S tokens (batch folded into M).
    xf = x_ref[...].reshape(B * S, D)                       # bf16
    qkv = jnp.dot(xf, wqkv_ref[...],
                  preferred_element_type=jnp.float32) + bqkv_ref[...]   # (B*S,3D)
    for b in range(B):                                      # static unroll (B small)
        qkv_b = qkv[b * S:(b + 1) * S]                      # (S, 3D)
        kmask = m_ref[b]                                    # (1, S): 1 = valid key
        # residual + output-projection bias, accumulated in f32
        y = bo_ref[...] + x_ref[b].astype(jnp.float32)      # (S, D)
        for h in range(nhead):                              # static unroll
            q = qkv_b[:, h * Dh:(h + 1) * Dh]
            k = qkv_b[:, D + h * Dh:D + (h + 1) * Dh]
            v = qkv_b[:, 2 * D + h * Dh:2 * D + (h + 1) * Dh]
            s = jnp.dot(q, k.T, preferred_element_type=jnp.float32) * scale
            s = jnp.where(kmask > 0.0, s, jnp.float32(-1e9))
            s = s - jnp.max(s, axis=-1, keepdims=True)
            p = jnp.exp(s)
            p = p / jnp.sum(p, axis=-1, keepdims=True)
            hout = jnp.dot(p, v, preferred_element_type=jnp.float32)    # (S, Dh)
            # Fold the head concat into Wo:  out += head_h @ Wo[h*Dh:(h+1)*Dh]
            y = y + jnp.dot(hout.astype(jnp.bfloat16),
                            wo_ref[h * Dh:(h + 1) * Dh, :],
                            preferred_element_type=jnp.float32)
        mu = jnp.mean(y, axis=-1, keepdims=True)
        yc = y - mu
        var = jnp.mean(yc * yc, axis=-1, keepdims=True)
        o_ref[b] = (yc * lax.rsqrt(var + 1e-5) * g_ref[...] + be_ref[...]
                    ).astype(o_ref.dtype)


def attention_layer(x, mask3, p, nhead):
    """x:(B,S,D) bf16, mask3:(B,1,S) f32 -> LN1(x + MHA(x)) as (B,S,D) bf16."""
    B, S, D = x.shape
    Dh = D // nhead
    return pl.pallas_call(
        functools.partial(_attn_layer_kernel, nhead=nhead,
                          scale=1.0 / math.sqrt(Dh)),
        out_shape=jax.ShapeDtypeStruct((B, S, D), jnp.bfloat16),
    )(x, mask3, p["wqkv"], p["bqkv"], p["wo"], p["bo"], p["ln1_g"], p["ln1_b"])


# ----------------------------------------------------------------------------
# Fused MoE layer: gating + packed heterogeneous experts + residual + LN2
# ----------------------------------------------------------------------------
def _moe_layer_kernel(h_ref, wg_ref, bg_ref, sel_ref, w1_ref, b1_ref, w2_ref,
                      b2_ref, lng_ref, lnb_ref,
                      o_ref, probs_ref, mask_ref,
                      acc_ref, gates_ref):
    c = pl.program_id(1)

    # ---- chunk 0: SNR-aware gating (softmax + top-2 + renorm), f32 on VPU ----
    @pl.when(c == 0)
    def _():
        hf = h_ref[...].astype(jnp.float32)
        logits = jnp.dot(hf, wg_ref[...],
                         preferred_element_type=jnp.float32) + bg_ref[...]
        logits = logits - jnp.max(logits, axis=-1, keepdims=True)
        ex = jnp.exp(logits)
        probs = ex / jnp.sum(ex, axis=-1, keepdims=True)
        probs_ref[...] = probs
        # top-2 over E experts: keep everything >= the 2nd-largest prob.
        # TODO(synk): exact ties can select >k experts (torch.topk breaks ties
        # by index); probability ~0 with continuous gate values.
        m1 = jnp.max(probs, axis=-1, keepdims=True)
        rest = jnp.where(probs >= m1, -jnp.inf, probs)
        m2 = jnp.max(rest, axis=-1, keepdims=True)
        emask = (probs >= m2).astype(jnp.float32)
        mask_ref[...] = emask
        w = probs * emask
        w = w / (jnp.sum(w, axis=-1, keepdims=True) + 1e-9)
        gates_ref[...] = w
        # expert output biases, added exactly once:  sum_e gate_e * b2_e
        acc_ref[...] = jnp.dot(w, b2_ref[...], preferred_element_type=jnp.float32)

    # ---- every chunk: one contiguous slab of packed expert hidden units ----
    hb = h_ref[...]                                               # bf16 (tm, D)
    h1 = jnp.dot(hb, w1_ref[...],
                 preferred_element_type=jnp.float32) + b1_ref[...]
    h1 = jnp.maximum(h1, 0.0)                                     # (tm, CHUNK)
    # per-hidden-unit gate = gate of the owning expert, via one-hot selector:
    # (tm, E) @ (E, CHUNK)  -- exact:  sum_e g_e*relu(..)W2_e == (relu(..)*G)W2
    g_exp = jnp.dot(gates_ref[...], sel_ref[...],
                    preferred_element_type=jnp.float32)           # (tm, CHUNK)
    acc_ref[...] += jnp.dot((h1 * g_exp).astype(jnp.bfloat16), w2_ref[...],
                            preferred_element_type=jnp.float32)

    # ---- last chunk: residual + LayerNorm2 ----
    @pl.when(c == pl.num_programs(1) - 1)
    def _():
        yout = h_ref[...].astype(jnp.float32) + acc_ref[...]
        mu = jnp.mean(yout, axis=-1, keepdims=True)
        yc = yout - mu
        var = jnp.mean(yc * yc, axis=-1, keepdims=True)
        o_ref[...] = (yc * lax.rsqrt(var + 1e-5) * lng_ref[...] + lnb_ref[...]
                      ).astype(o_ref.dtype)


def moe_ffn_layer(h, p, bg_eff, sel, chunk, num_experts):
    """h:(M,D) bf16.  Single pallas_call: gating + all packed expert chunks +
    residual + LN2.  Grid = (m_tiles 'parallel', hidden_chunks 'arbitrary')."""
    M, D = h.shape
    E = num_experts
    h_total = p["w1p"].shape[1]
    n_chunks = h_total // chunk
    tm = _pick_tile_m(M)
    out, probs, emask = pl.pallas_call(
        _moe_layer_kernel,
        out_shape=(jax.ShapeDtypeStruct((M, D), jnp.bfloat16),
                   jax.ShapeDtypeStruct((M, E), jnp.float32),
                   jax.ShapeDtypeStruct((M, E), jnp.float32)),
        grid=(M // tm, n_chunks),
        in_specs=[
            pl.BlockSpec((tm, D), lambda i, c: (i, 0)),          # h (bf16)
            pl.BlockSpec((D, E), lambda i, c: (0, 0)),           # gate weight
            pl.BlockSpec((1, E), lambda i, c: (0, 0)),           # gate bias (+SNR)
            pl.BlockSpec((E, chunk), lambda i, c: (0, c)),       # hidden->expert one-hot
            pl.BlockSpec((D, chunk), lambda i, c: (0, c)),       # W1 chunk (packed)
            pl.BlockSpec((1, chunk), lambda i, c: (0, c)),       # b1 chunk
            pl.BlockSpec((chunk, D), lambda i, c: (c, 0)),       # W2 chunk (packed)
            pl.BlockSpec((E, D), lambda i, c: (0, 0)),           # b2 (all experts)
            pl.BlockSpec((1, D), lambda i, c: (0, 0)),           # ln2 gamma
            pl.BlockSpec((1, D), lambda i, c: (0, 0)),           # ln2 beta
        ],
        out_specs=(pl.BlockSpec((tm, D), lambda i, c: (i, 0)),
                   pl.BlockSpec((tm, E), lambda i, c: (i, 0)),
                   pl.BlockSpec((tm, E), lambda i, c: (i, 0))),
        scratch_shapes=[pltpu.VMEM((tm, D), jnp.float32),        # MoE accumulator
                        pltpu.VMEM((tm, E), jnp.float32)],       # gate weights
        compiler_params=pltpu.CompilerParams(
            dimension_semantics=("parallel", "arbitrary")),
    )(h, p["wg_x"], bg_eff, sel, p["w1p"], p["b1p"], p["w2p"], p["b2all"],
      p["ln2_g"], p["ln2_b"])
    return out, probs, emask


# ----------------------------------------------------------------------------
# Model glue
# ----------------------------------------------------------------------------
def moe_transformer_layer(x, mask3, snr, p, sel, chunk, nhead, num_experts):
    B, S, D = x.shape
    h = attention_layer(x, mask3, p, nhead)                       # (B,S,D) bf16
    # SNR enters the gate through a dedicated column folded into the bias.
    bg_eff = (p["bg"] + (snr / 20.0) * p["wg_snr"][0]).reshape(1, -1)
    out, probs, emask = moe_ffn_layer(h.reshape(B * S, D), p, bg_eff, sel,
                                      chunk, num_experts)
    return (out.reshape(B, S, D),
            probs.reshape(B, S, num_experts),
            emask.reshape(B, S, num_experts))


def hetero_moe_transformer(x, mask3, snr, layers, sel, chunk, nhead, num_experts):
    gate_scores, expert_masks = [], []
    for lp in layers:
        x, g, m = moe_transformer_layer(x, mask3, snr, lp, sel, chunk,
                                        nhead, num_experts)
        gate_scores.append(g)
        expert_masks.append(m)
    return x, gate_scores, expert_masks


def wireless_channel(x, snr_db, fading, key):
    # fading='none' -> AWGN only (deterministic noise draw for reproducibility).
    # TODO(synk): Rician/Rayleigh fading branches of ComplexWirelessChannel not reproduced.
    power = jnp.mean(x * x)
    sigma = jnp.sqrt(power / (10.0 ** (snr_db / 10.0)))
    noise = sigma * jax.random.normal(key, x.shape, dtype=x.dtype)
    return x + noise


def semcom_forward(params, input_ids, attn_mask, task_id, snr, fading="none"):
    B, S = input_ids.shape
    D = params["d_model"]
    nhead = params["nhead"]
    E = params["num_experts"]
    sel = params["chunk_sel"]
    chunk = params["moe_chunk"]

    # --- BERTTextEncoder (synthetic) + TaskPrompt, fused into one projection ---
    # concat([emb @ W + b, prompt]) == emb @ [W | 0] + [b | prompt]
    emb = params["text_emb"][input_ids]                           # (B,S,bert_hidden)
    fused_bias = jnp.concatenate([params["text_proj_b"],
                                  params["task_prompt"][task_id]])
    fused = dense(emb.reshape(B * S, -1), params["text_proj_w_fused"],
                  fused_bias, out_dtype=jnp.bfloat16).reshape(B, S, D)
    input_lengths = jnp.sum(attn_mask, axis=1).astype(jnp.int32)
    mask3 = attn_mask.astype(jnp.float32).reshape(B, 1, S)

    # --- encoder transformer ---
    enc, enc_g, enc_m = hetero_moe_transformer(
        fused, mask3, snr, params["encoder"], sel, chunk, nhead, E)
    semantic_encoded = enc.astype(jnp.float32)

    # --- physical channel (AWGN) ---
    rx = wireless_channel(semantic_encoded, snr, fading, jax.random.PRNGKey(42))

    # --- decoder transformer ---
    dec, dec_g, dec_m = hetero_moe_transformer(
        rx.astype(jnp.bfloat16), mask3, snr, params["decoder"], sel, chunk, nhead, E)
    semantic_decoded = dec.astype(jnp.float32)

    # --- MultiTaskHead: per-task linear to vocab logits ---
    # TODO(synk): original head also consumes input_lengths/input_ids (loss-side bookkeeping).
    logits = dense(dec.reshape(B * S, D), params["head_w"][task_id],
                   params["head_b"][task_id],
                   out_dtype=jnp.float32).reshape(B, S, -1)

    return (logits, input_ids, input_lengths, semantic_encoded, semantic_decoded,
            enc_g + dec_g, enc_m + dec_m)


# ----------------------------------------------------------------------------
# Deterministic parameter init (MXU weights stored bf16)
# ----------------------------------------------------------------------------
def _normal(key, shape, scale=0.02):
    return scale * jax.random.normal(key, shape, dtype=jnp.float32)


def init_layer(key, D, expert_sizes, expert_sizes_pad, num_experts):
    E = num_experts
    ks = jax.random.split(key, 6 + 2 * E)
    wq, wk, wv = (_normal(ks[i], (D, D)) for i in range(3))
    p = {
        "wqkv": jnp.concatenate([wq, wk, wv], axis=1).astype(jnp.bfloat16),
        "bqkv": jnp.zeros((1, 3 * D), jnp.float32),
        "wo": _normal(ks[3], (D, D)).astype(jnp.bfloat16),
        "bo": jnp.zeros((1, D), jnp.float32),
        "ln1_g": jnp.ones((1, D), jnp.float32), "ln1_b": jnp.zeros((1, D), jnp.float32),
        "ln2_g": jnp.ones((1, D), jnp.float32), "ln2_b": jnp.zeros((1, D), jnp.float32),
        "wg_x": _normal(ks[4], (D, E)),          # gate weights kept f32 (tiny)
        "wg_snr": _normal(ks[5], (1, E)),        # SNR column (folded into bias)
        "bg": jnp.zeros((E,), jnp.float32),
    }
    # Heterogeneous experts packed contiguously (each padded only up to the
    # next multiple of 128 lanes, NOT to He_max).  Padded W1 columns / W2 rows
    # are zero, so padding is exact (relu(0)=0 contributes nothing).
    w1s, w2s = [], []
    for e in range(E):
        He, Hp = expert_sizes[e], expert_sizes_pad[e]
        w1 = _normal(ks[6 + 2 * e], (D, He))
        w2 = _normal(ks[7 + 2 * e], (He, D))
        w1s.append(jnp.pad(w1, ((0, 0), (0, Hp - He))))
        w2s.append(jnp.pad(w2, ((0, Hp - He), (0, 0))))
    h_total = sum(expert_sizes_pad)
    p["w1p"] = jnp.concatenate(w1s, axis=1).astype(jnp.bfloat16)   # (D, H_total)
    p["b1p"] = jnp.zeros((1, h_total), jnp.float32)
    p["w2p"] = jnp.concatenate(w2s, axis=0).astype(jnp.bfloat16)   # (H_total, D)
    p["b2all"] = jnp.zeros((E, D), jnp.float32)
    return p


def init_params(key, *, num_tasks, embed_dim, task_dim, num_experts, vocab_size,
                bert_hidden, num_layers, nhead):
    D = embed_dim + task_dim
    dim_ff = D * 4
    step = dim_ff // num_experts                       # 'arithmetic' expert sizes
    expert_sizes = [step * (e + 1) for e in range(num_experts)]
    expert_sizes_pad = [int(np.ceil(h / LANE)) * LANE for h in expert_sizes]
    h_total = sum(expert_sizes_pad)
    chunk = _pick_chunk(h_total)

    # hidden-unit -> owning-expert one-hot selector (shared by all layers)
    sel = np.zeros((num_experts, h_total), np.float32)
    col = 0
    for e, hp in enumerate(expert_sizes_pad):
        sel[e, col:col + hp] = 1.0
        col += hp

    ks = jax.random.split(key, 4)
    text_proj_w = _normal(ks[1], (bert_hidden, embed_dim))
    # fold the TaskPrompt concat into the projection weight (zero task columns)
    text_proj_w_fused = jnp.concatenate(
        [text_proj_w, jnp.zeros((bert_hidden, task_dim), jnp.float32)], axis=1)

    params = {
        "nhead": nhead,
        "num_experts": num_experts,
        "d_model": D,
        "expert_sizes": expert_sizes,
        "moe_chunk": chunk,
        "chunk_sel": jnp.asarray(sel),
        "text_emb": _normal(ks[0], (vocab_size, bert_hidden), scale=0.1),
        "text_proj_w_fused": text_proj_w_fused.astype(jnp.bfloat16),
        "text_proj_b": jnp.zeros((embed_dim,), jnp.float32),
        "task_prompt": _normal(ks[2], (num_tasks, task_dim), scale=0.1),
        "head_w": _normal(ks[3], (num_tasks, D, vocab_size)).astype(jnp.bfloat16),
        "head_b": jnp.zeros((num_tasks, vocab_size), jnp.float32),
        "encoder": [init_layer(jax.random.fold_in(ks[3], 100 + i), D, expert_sizes,
                               expert_sizes_pad, num_experts)
                    for i in range(num_layers)],
        "decoder": [init_layer(jax.random.fold_in(ks[3], 200 + i), D, expert_sizes,
                               expert_sizes_pad, num_experts)
                    for i in range(num_layers)],
    }
    return params


# ----------------------------------------------------------------------------
# Main
# ----------------------------------------------------------------------------
if __name__ == "__main__":
    B, S = 2, 8
    # D = embed_dim + task_dim = 128 (lane-dense), Dh = 32, dim_ff = 512
    num_tasks, embed_dim, task_dim = 3, 96, 32
    num_experts, num_layers, nhead = 4, 2, 4
    vocab_size, bert_hidden = 128, 128
    snr = 15.0

    key = jax.random.PRNGKey(0)
    k_param, k_ids = jax.random.split(key)
    params = init_params(k_param, num_tasks=num_tasks, embed_dim=embed_dim,
                         task_dim=task_dim, num_experts=num_experts,
                         vocab_size=vocab_size, bert_hidden=bert_hidden,
                         num_layers=num_layers, nhead=nhead)

    input_ids = jax.random.randint(k_ids, (B, S), 0, vocab_size, dtype=jnp.int32)
    attn_mask = jnp.ones((B, S), jnp.float32).at[1, 6:].set(0.0)   # second sample padded
    task_id = 1

    outputs = semcom_forward(params, input_ids, attn_mask, task_id, snr, fading="none")
    jax.block_until_ready(outputs)

    logits = outputs[0]
    assert logits.shape == (B, S, vocab_size)
    assert len(outputs[5]) == 2 * num_layers and len(outputs[6]) == 2 * num_layers
    assert bool(jnp.all(jnp.isfinite(logits)))
    print("KERNEL_OK")
</pallas_src>

<mosaic_0001>
module attributes {stable_mosaic.version = 11 : i64} {
  func.func @_dense_kernel(%arg0: i32, %arg1: i32, %arg2: i32, %arg3: memref<8x128xf32, #tpu.memory_space<vmem>>, %arg4: memref<128x128xbf16, #tpu.memory_space<vmem>>, %arg5: memref<1x128xf32, #tpu.memory_space<vmem>>, %arg6: memref<8x128xbf16, #tpu.memory_space<vmem>>, %arg7: memref<8x128xf32, #tpu.memory_space<vmem>>) attributes {dimension_semantics = [#tpu.dimension_semantics<parallel>, #tpu.dimension_semantics<parallel>, #tpu.dimension_semantics<arbitrary>], iteration_bounds = array<i64: 2, 1, 1>, scalar_prefetch = 0 : i64, scratch_operands = 1 : i64, tpu.core_type = #tpu.core_type<tc>, window_params = [{transform_indices = @transform_0, window_bounds = array<i64: 8, 128>}, {transform_indices = @transform_1, window_bounds = array<i64: 128, 128>}, {transform_indices = @transform_2, window_bounds = array<i64: 1, 128>}, {transform_indices = @transform_3, window_bounds = array<i64: 8, 128>}]} {
    %c0_i32 = arith.constant 0 : i32
    %0 = arith.cmpi eq, %arg2, %c0_i32 : i32
    %1 = arith.extui %0 : i1 to i32
    %c0_i32_0 = arith.constant 0 : i32
    %2 = arith.cmpi ne, %1, %c0_i32_0 : i32
    scf.if %2 {
      %cst_10 = arith.constant 0.000000e+00 : f32
      %13 = vector.broadcast %cst_10 : f32 to vector<8x128xf32>
      %c0_11 = arith.constant 0 : index
      %c0_12 = arith.constant 0 : index
      %14 = vector.load %arg7[%c0_11, %c0_12] : memref<8x128xf32, #tpu.memory_space<vmem>>, vector<8x128xf32>
      tpu.vector_store %arg7[%c0_11, %c0_12], %13 {strides = array<i32>} : memref<8x128xf32, #tpu.memory_space<vmem>>, vector<8x128xf32>,
    } else {
    }
    %c0 = arith.constant 0 : index
    %c0_1 = arith.constant 0 : index
    %3 = vector.load %arg7[%c0, %c0_1] : memref<8x128xf32, #tpu.memory_space<vmem>>, vector<8x128xf32>
    %c0_2 = arith.constant 0 : index
    %c0_3 = arith.constant 0 : index
    %4 = vector.load %arg3[%c0_2, %c0_3] : memref<8x128xf32, #tpu.memory_space<vmem>>, vector<8x128xf32>
    %5 = arith.truncf %4 : vector<8x128xf32> to vector<8x128xbf16>
    %c0_4 = arith.constant 0 : index
    %c0_5 = arith.constant 0 : index
    %6 = vector.load %arg4[%c0_4, %c0_5] : memref<128x128xbf16, #tpu.memory_space<vmem>>, vector<128x128xbf16>
    %cst = arith.constant dense<0.000000e+00> : vector<8x128xf32>
    %7 = tpu.matmul %5, %6, %cst {dimension_numbers = #tpu.dot_dimension_numbers<[1], [0], [0], [1], [0, 0, 1, 1], [], []>} : vector<8x128xbf16>, vector<128x128xbf16>, vector<8x128xf32> -> vector<8x128xf32>
    %8 = arith.addf %3, %7 : vector<8x128xf32>
    %c0_6 = arith.constant 0 : index
    %c0_7 = arith.constant 0 : index
    %9 = vector.load %arg7[%c0_6, %c0_7] : memref<8x128xf32, #tpu.memory_space<vmem>>, vector<8x128xf32>
    tpu.vector_store %arg7[%c0_6, %c0_7], %8 {strides = array<i32>} : memref<8x128xf32, #tpu.memory_space<vmem>>, vector<8x128xf32>,
    %c0_i32_8 = arith.constant 0 : i32
    %10 = arith.cmpi eq, %arg2, %c0_i32_8 : i32
    %11 = arith.extui %10 : i1 to i32
    %c0_i32_9 = arith.constant 0 : i32
    %12 = arith.cmpi ne, %11, %c0_i32_9 : i32
    scf.if %12 {
      %c0_10 = arith.constant 0 : index
      %c0_11 = arith.constant 0 : index
      %13 = vector.load %arg7[%c0_10, %c0_11] : memref<8x128xf32, #tpu.memory_space<vmem>>, vector<8x128xf32>
      %c0_12 = arith.constant 0 : index
      %c0_13 = arith.constant 0 : index
      %14 = vector.load %arg5[%c0_12, %c0_13] : memref<1x128xf32, #tpu.memory_space<vmem>>, vector<1x128xf32>
      %15 = vector.broadcast %14 : vector<1x128xf32> to vector<8x128xf32>
      %16 = arith.addf %13, %15 : vector<8x128xf32>
      %17 = arith.truncf %16 : vector<8x128xf32> to vector<8x128xbf16>
      %c0_14 = arith.constant 0 : index
      %c0_15 = arith.constant 0 : index
      %18 = vector.load %arg6[%c0_14, %c0_15] : memref<8x128xbf16, #tpu.memory_space<vmem>>, vector<8x128xbf16>
      tpu.vector_store %arg6[%c0_14, %c0_15], %17 {strides = array<i32>} : memref<8x128xbf16, #tpu.memory_space<vmem>>, vector<8x128xbf16>,
    } else {
    }
    return
  }
  func.func @transform_0(%arg0: i32, %arg1: i32, %arg2: i32) -> (i32, i32) {
    %c0_i32 = arith.constant 0 : i32
    return %arg0, %arg2 : i32, i32
  }
  func.func @transform_1(%arg0: i32, %arg1: i32, %arg2: i32) -> (i32, i32) {
    %c0_i32 = arith.constant 0 : i32
    return %arg2, %arg1 : i32, i32
  }
  func.func @transform_2(%arg0: i32, %arg1: i32, %arg2: i32) -> (i32, i32) {
    %c0_i32 = arith.constant 0 : i32
    %c0_i32_0 = arith.constant 0 : i32
    return %c0_i32, %arg1 : i32, i32
  }
  func.func @transform_3(%arg0: i32, %arg1: i32, %arg2: i32) -> (i32, i32) {
    %c0_i32 = arith.constant 0 : i32
    return %arg0, %arg1 : i32, i32
  }
}

</mosaic_0001>

<bundles_post_ra>
// kernel: tpu_custom_call.1
= control target key start
LH: loop header
LB: loop body
LE: loop exit
PB: predicated region body
PF: predicated region fallthrough
CT: control target
= control target key end

     0   :  { %8 = vsyncpa [#allocation4], 0  ;;  %s993_s0 = inlined_call_operand.hbm [shape: f32[16,128], index: 0, kind: input, shape index: {}]   ;;  %s994_s1 = inlined_call_operand.hbm [shape: bf16[128,128], index: 1, kind: input, shape index: {}]   ;;  %s995_s2 = inlined_call_operand.vmem [shape: f32[1,128], index: 2, kind: input, shape index: {}]   ;;  %s996_s3 = inlined_call_operand.hbm [shape: bf16[16,128], index: 3, kind: output, shape index: {}]  }
   0x1   :  { %10 = vsyncpa [#allocation4 + $0x1], 0 }
   0x2   :  { %11 = vsyncpa [#allocation7], 0 }
   0x3   :  { %12 = vsyncpa [#allocation5], 0 }
   0x4   :  { %14 = vsyncpa [#allocation5 + $0x1], 0  ;;  %s810_s12 = smov 0   ;;  %s812_s13 = smov 0  }
   0x5   :  { %s814_s14 = smov 0   ;;  %s816_s15 = smov 0  }
   0x6   :  { %s818_s16 = smov 0   ;;  %s820_s17 = smov 0  }
   0x7 LB: > { %s504_s18 = sadd.s32 4294967295, %s781_s17   ;;  %s505_s19 = sadd.s32 4294967294, %s781_s17   ;;  %s781_s17 = sphi %s820_s17, %s20_s17   ;;  %s777_s16 = sphi %s818_s16, %s1014_s16   ;;  %s773_s15 = sphi %s816_s15, %s1013_s15   ;;  %s769_s14 = sphi %s814_s14, %s1012_s14   ;;  %s765_s13 = sphi %s812_s13, %s1011_s13   ;;  %s761_s12 = sphi %s810_s12, %s1010_s12  }
   0x8   : > { %p61_p0 = scmp.ne.s32.totalorder %s765_s13, %s761_s12  ;;  %p844_p1 = scmp.eq.s32.totalorder %s504_s18, 0 }
   0x9   : > { %p848_p2 = scmp.eq.s32.totalorder %s504_s18, 1  ;;  %p147_p3 = scmp.eq.s32.totalorder %s505_s19, 1 }
   0xa   : > { %p854_p4 = por %p844_p1, %p61_p0  ;;  %p506_p5 = scmp.ge.s32.totalorder %s781_s17, 1 }
   0xb   : > { %p859_p6 = por %p147_p3, %p61_p0  ;;  %p154_p7 = scmp.lt.s32.totalorder %s781_s17, 3 }
   0xc   : > { %s1000_s22 = scalar_select %p854_p4, 1, 0 }
   0xd   : > { %s1001_s23 = scalar_select %p859_p6, 1, 0 }
   0xe   : > { %p864_p8 = pnand %p506_p5, %p154_p7  ;;  %s783_s25 = smov [#allocation6]  }
   0xf   : > { %s170_s26 = sshll.u32 %s783_s25, 4  ;;  %s39_s28 = sadd.s32 1, %s777_s16  ;;  %s171_s26 = int_to_ptr.vmem [resolvable:$true] %s170_s26 }
  0x10   : > { %p566_p9 = pneg %p864_p8  ;;  %s654_s29 = scalar_lea.vmem %s171_s26, 1024 }
  0x11   : > { %p655_p13 = scmp.ne.s32.totalorder %s171_s26, %s654_s29  ;;  %p662_p5 = scmp.lt.s32.totalorder %s171_s26, %s171_s26 }
  0x12   : > { %p873_p11 = pnand %p566_p9, %p844_p1  ;;  %p663_p7 = scmp.lt.s32.totalorder %s654_s29, %s654_s29 }
  0x14   : > { %p645_p12 = pneg %p873_p11  ;;  %p664_p6 = por %p663_p7, %p662_p5 }
  0x16   : > { %p657_p0 = pnand %p655_p13, %p645_p12 }
  0x18   : > { %p658_p3 = pneg %p657_p0 }
  0x1a   : > { %p665_p4 = pnand %p664_p6, %p658_p3 }
  0x1c   : > { %668 = shalt.err (!%p665_p4)
}
  0x1d   : > { %s784_s30 = smov 64   ;;  %s785_s4 = smov 4  }
  0x1e   : > { %569 = dma.hbm_to_vmem [thread:$0]  (!%p873_p11), %s994_s1, 1024, %s171_s26, [#allocation7], %s784_s30, %s784_s30, %s785_s4  }
  0x1f   : > { %p41_p6 = scmp.ge.s32.totalorder %s39_s28, 2  ;;  %s48_s7 = sadd.s32 1, %s769_s14 }
  0x20   : > { %p55_p4 = scmp.ne.s32.totalorder %s769_s14, %s765_s13  ;;  %p56_p9 = scmp.eq.s32.totalorder %s781_s17, 0 }
  0x21   : > { %s1016_s28 = smov (%p41_p6, %s39_s28), 0  ;;  %p579_p0 = scmp.lt.s32.totalorder %s781_s17, 2 }
  0x22   : > { %p891_p12 = por %p56_p9, %p55_p4  ;;  %p897_p13 = por %p848_p2, %p55_p4 }
  0x23   : > { %s43_s10 = ssub.s32 %s777_s16, %s1016_s28  ;;  %s190_s11 = sand.u32 1, %s769_s14  }
  0x24   : > { %p46_p11 = scmp.eq.s32.totalorder %s43_s10, 0  ;;  %s510_s18 = sshll.u32 %s190_s11, 3 }
  0x25   : > { %s511_s25 = sshll.u32 %s777_s16, 7  ;;  %s194_s30 = scalar_lea.vmem [#allocation3], %s510_s18 }
  0x26   : > { %s906_s19 = scalar_select %p46_p11, %s769_s14, %s48_s7  }
  0x27   : > { %s200_s29 = scalar_lea.hbm %s993_s0, %s511_s25  ;;  %s202_s4 = sshll.u32 %s194_s30, 4  ;;  %s203_s4 = int_to_ptr.vmem [resolvable:$true] %s202_s4 }
  0x28   : > { %p914_p2 = pnand %p579_p0, %p891_p12  ;;  %s191_s5 = scalar_lea.sflag [#allocation4], %s190_s11 }
  0x29   : > { %s682_s6 = scalar_lea.vmem %s203_s4, 128  ;;  %s786_s7 = smov [#allocation3]  }
  0x2a   : > { %p671_p3 = pneg %p914_p2  ;;  %p683_p5 = scmp.ne.s32.totalorder %s203_s4, %s682_s6 }
  0x2b   : > { %s687_s10 = sshll.u32 %s786_s7, 4  ;;  %s688_s10 = int_to_ptr.vmem [resolvable:$false] %s687_s10 }
  0x2c   : > { %p685_p7 = pnand %p683_p5, %p671_p3  ;;  %s689_s25 = scalar_lea.vmem %s688_s10, 256 }
  0x2d   : > { %p690_p4 = scmp.lt.s32.totalorder %s203_s4, %s688_s10  ;;  %p691_p9 = scmp.lt.s32.totalorder %s689_s25, %s682_s6 }
  0x2e   : > { %p686_p6 = pneg %p685_p7 }
  0x2f   : > { %p692_p11 = por %p691_p9, %p690_p4 }
  0x31   : > { %p693_p10 = pnand %p692_p11, %p686_p6 }
  0x33   : > { %696 = shalt.err (!%p693_p10)
}
  0x34   : > { %573 = dma.hbm_to_vmem [thread:$0]  (!%p914_p2), %s200_s29, 128, %s203_s4, %s191_s5  }
  0x35   : > { %211 = sbr.rel (%p864_p8) target bundleno = 305 (0x131), region = 32  ;;  %s925_s8 = sand.u32 (!%p864_p8), 1, %s765_s13  }
  0x36   : > { %s513_s11 = sshll.u32 (!%p864_p8), %s925_s8, 3  ;;  %s214_s18 = scalar_lea.sflag (!%p864_p8), [#allocation4], %s925_s8 }
  0x37   : > { %s217_s26 = scalar_lea.vmem (!%p864_p8), [#allocation3], %s513_s11  ;;  %p1007_p12 = scmp.ne.s32.totalorder (!%p864_p8), %s1000_s22, 0 }
  0x3a   : > { %748 = dma.done.wait (%p1007_p12), %s214_s18, 128  }
  0x3b   : > { %750 = vsyncadd (%p1007_p12), %s214_s18, 4294967168 }
  0x3c   : > { %752 = dma.done.wait (%p844_p1), [#allocation7], 1024  }
  0x3d   : > { %754 = vsyncadd (%p844_p1), [#allocation7], 4294966272  ;;  %v787_v0 = vmov 0.0   ;;  %vm788_vm0 = vmmov 0   ;;  %v635_v1 = vld [vmem:[#allocation6 + $0x38] sm:$0xff]   ;;  %v636_v2 = vld [vmem:[#allocation6 + $0x30] sm:$0xff]  }
  0x3e   : > { %538 = vmatprep.subr.bf16.mxu0 %v787_v0  ;;  %554 = vmatprep.mubr.msk.bf16.mxu0 %vm788_vm0, %v787_v0  ;;  %v637_v3 = vld [vmem:[#allocation6 + $0x28] sm:$0xff]   ;;  %v638_v4 = vld [vmem:[#allocation6 + $0x20] sm:$0xff]   ;;  %v639_v5 = vld [vmem:[#allocation6 + $0x18] sm:$0xff]   ;;  %s515_s20 = sshll.u32 %s925_s8, 2  ;;  %s526_s27 = sshll.u32 %s773_s15, 6 }
  0x3f   : > { %539 = vmatpush3.bf16.msra.mxu0 %v635_v1  ;;  %v640_v6 = vld [vmem:[#allocation6 + $0x10] sm:$0xff]   ;;  %v641_v7 = vld [vmem:[#allocation6 + $0x8] sm:$0xff]   ;;  %v642_v8 = vld [vmem:[#allocation6] sm:$0xff]   ;;  %s246_s29 = scalar_lea.vmem [#allocation8], %s515_s20  ;;  %s945_s5 = scalar_lea.hbm %s996_s3, %s526_s27 }
  0x40   : > { %540 = vmatprep.subr.bf16.mxu0 %v787_v0  ;;  %v258_v9 = vld [vmem:[%s217_s26] sm:$0xff]  ;;  %s395_s30 = sshll.u32 %s246_s29, 4  ;;  %s381_s6 = scalar_lea.sflag [#allocation5], %s925_s8  ;;  %s947_s30 = int_to_ptr.vmem [resolvable:$true] %s395_s30 }
  0x41   : > { %v259_v10 = vpack.c.bf16 %v258_v9, %v258_v9  ;;  %v524_v11 = vld [vmem:[%s995_s2] ss:$0 sm:$0xff]  ;;  %s697_s15 = scalar_lea.vmem %s947_s30, 64  ;;  %s789_s7 = smov [#allocation8]  }
  0x42   : > { %p698_p1 = scmp.ne.s32.totalorder %s947_s30, %s697_s15  ;;  %s701_s10 = sshll.u32 %s789_s7, 4  ;;  %s702_s10 = int_to_ptr.vmem [resolvable:$false] %s701_s10 }
  0x43   : > { %541 = vmatpush3.bf16.msra.mxu0 %v636_v2  ;;  %s703_s25 = scalar_lea.vmem %s702_s10, 128  ;;  %p704_p0 = scmp.lt.s32.totalorder %s947_s30, %s702_s10 }
  0x44   : > { %542 = vmatprep.subr.bf16.mxu0 %v787_v0  ;;  %p699_p8 = pnand %p698_p1, %p897_p13  ;;  %p705_p2 = scmp.lt.s32.totalorder %s703_s25, %s697_s15 }
  0x46   : > { %p700_p10 = pneg %p699_p8  ;;  %p706_p3 = por %p705_p2, %p704_p0 }
  0x47   : > { %543 = vmatpush3.bf16.msra.mxu0 %v637_v3 }
  0x48   : > { %544 = vmatprep.subr.bf16.mxu0 %v787_v0  ;;  %p707_p5 = pnand %p706_p3, %p700_p10 }
  0x4b   : > { %545 = vmatpush3.bf16.msra.mxu0 %v638_v4 }
  0x4c   : > { %546 = vmatprep.subr.bf16.mxu0 %v787_v0 }
  0x4f   : > { %547 = vmatpush3.bf16.msra.mxu0 %v639_v5 }
  0x50   : > { %548 = vmatprep.subr.bf16.mxu0 %v787_v0 }
  0x53   : > { %549 = vmatpush3.bf16.msra.mxu0 %v640_v6 }
  0x54   : > { %550 = vmatprep.subr.bf16.mxu0 %v787_v0 }
  0x57   : > { %551 = vmatpush3.bf16.msra.mxu0 %v641_v7 }
  0x58   : > { %552 = vmatprep.subr.bf16.mxu0 %v787_v0 }
  0x5b   : > { %553 = vmatpush3.bf16.msra.mxu0 %v642_v8 }
  0x5e   : > { %555 = vmatmul.mubr.bf16.vlgmr.msra.gmra.mxu0 %v259_v10 }
 0x11e   : > { %v358_v12 = vpop.f32.mrf.mxu0 }
 0x11f   : > { %v377_v13 = vadd.f32 %v524_v11, %v358_v12 }
 0x120   : > { %v556_v14 = vpop.f32.mrf.mxu0 }
 0x121   : > { %v378_v15 = vpack.c.bf16 %v377_v13, %v377_v13 }
 0x122   : > { %v361_v16 = vpop.f32.mrf.mxu0 }
 0x123   : > { %379 = vst [vmem:[%s246_s29] sm:$0xf] %v378_v15 }
 0x124   : > { %v557_v17 = vpop.f32.mrf.mxu0 }
 0x125   : > { %710 = shalt.err (!%p707_p5)
}
 0x126   : > { %s711_s11 = scalar_lea.hbm %s945_s5, 64  ;;  %s715_s26 = scalar_lea.hbm %s996_s3, 128 }
 0x127   : > { %p712_p7 = scmp.ne.s32.totalorder %s945_s5, %s711_s11  ;;  %p716_p9 = scmp.lt.s32.totalorder %s945_s5, %s996_s3 }
 0x128   : > { %p717_p11 = scmp.lt.s32.totalorder %s715_s26, %s711_s11 }
 0x129   : > { %p713_p6 = pnand %p712_p7, %p897_p13 }
 0x12a   : > { %p718_p12 = por %p717_p11, %p716_p9 }
 0x12b   : > { %p714_p4 = pneg %p713_p6 }
 0x12d   : > { %p719_p1 = pnand %p718_p12, %p714_p4 }
 0x12f   : > { %722 = shalt.err (!%p719_p1)
}
 0x130   : > { %564 = dma.vmem_to_hbm [thread:$0]  (%p897_p13), %s947_s30, 64, %s945_s5, %s381_s6  }
 0x131 PF: > { %s407_s24 = sand.u32 1, %s761_s12   ;;  %p1008_p8 = scmp.ne.s32.totalorder %s1001_s23, 0 }
 0x132   : > { %p1009_p10 = scmp.ge.s32.totalorder %s781_s17, 2  ;;  %s408_s27 = scalar_lea.sflag [#allocation5], %s407_s24 }
 0x134   : > { %p575_p0 = pnand %p1009_p10, %p1008_p8 }
 0x136   : > { %p576_p2 = pneg %p575_p0 }
 0x138   : > { %756 = dma.done.wait (%p576_p2), %s408_s27, 64  }
 0x139   : > { %758 = vsyncadd (%p576_p2), %s408_s27, 4294967232  ;;  %s20_s17 = sadd.s32 1, %s781_s17   ;;  %s1010_s12 = smov %s765_s13 }
 0x13a   : > { %p17_p3 = scmp.ge.s32.totalorder %s20_s17, 4   ;;  %s1011_s13 = smov %s769_s14 }
 0x13b   : > { %s1012_s14 = smov %s906_s19  ;;  %s1013_s15 = smov %s777_s16 }
 0x13c   : > { %s1014_s16 = smov %s1016_s28  ;;  %19 = sbr.rel (!%p17_p3) target bundleno = 7 (0x7), region = 93 }
 0x141   :  { %413 = vsyncpa [#allocation4], 1 }
 0x142   :  { %415 = vsyncpa [#allocation4 + $0x1], 1 }
 0x143   :  { %416 = vsyncpa [#allocation7], 1 }
 0x144   :  { %417 = vsyncpa [#allocation5], 1 }
 0x145   :  { %419 = vsyncpa [#allocation5 + $0x1], 1 }

</bundles_post_ra>
